<compile_context>
chip_gen: v5e
topology: v5e:2x2
jax: 0.10.0
libtpu: 0.0.40
codegen_flags: <defaults>
</compile_context>

<pallas_src>
import functools
import math

import jax
import jax.numpy as jnp
from jax.experimental import pallas as pl
from jax.experimental.pallas import tpu as pltpu


# ----------------------------------------------------------------------------
# Fused MHA kernel: one batch element per grid step
# ----------------------------------------------------------------------------
def _mha_kernel(xq_ref, xk_ref, xv_ref, w_ref, bias_ref, o_ref, *, n_heads, d_k):
    # Per-batch activations, lane axis = d_model.  Cast to bf16 only as MXU
    # operands; everything accumulated / reduced in f32.
    xq = xq_ref[0].astype(jnp.bfloat16)                # (S, D)
    xk = xk_ref[0].astype(jnp.bfloat16)
    xv = xv_ref[0].astype(jnp.bfloat16)

    # Stacked bf16 weights, already (d_in, d_out); W_Q carries the 1/sqrt(d_k).
    wq = w_ref[0]                                      # (D, D) bf16
    wk = w_ref[1]
    wv = w_ref[2]
    wfc = w_ref[3]

    # Q/K/V projections: bf16 MXU operands, f32 accumulate, f32 bias add.
    q = jnp.dot(xq, wq, preferred_element_type=jnp.float32) + bias_ref[0:1, :]
    k = jnp.dot(xk, wk, preferred_element_type=jnp.float32) + bias_ref[1:2, :]
    v = jnp.dot(xv, wv, preferred_element_type=jnp.float32) + bias_ref[2:3, :]

    # bf16 copies for the attention matmuls (softmax stats stay f32).
    q_b = q.astype(jnp.bfloat16)
    k_b = k.astype(jnp.bfloat16)
    v_b = v.astype(jnp.bfloat16)

    S, D = q.shape
    out_acc = jnp.zeros((S, D), jnp.float32)

    # Per-head attention; heads are static lane slices.  The head merge is
    # folded into the output projection via accumulation against the matching
    # W_fc row block (no concatenate).
    for h in range(n_heads):                           # static unroll, H small
        lo = h * d_k
        qh = q_b[:, lo:lo + d_k]                       # (S, d_k) bf16
        kh = k_b[:, lo:lo + d_k]
        vh = v_b[:, lo:lo + d_k]
        # scores = qh @ kh^T (contract the two minor dims; scale already
        # folded into W_Q/b_Q in the wrapper).
        s = jax.lax.dot_general(qh, kh, (((1,), (1,)), ((), ())),
                                preferred_element_type=jnp.float32)   # (S, S)
        m = jnp.max(s, axis=-1, keepdims=True)         # stable softmax, f32
        e = jnp.exp(s - m)
        l = jnp.sum(e, axis=-1, keepdims=True)
        pv = jnp.dot(e.astype(jnp.bfloat16), vh,
                     preferred_element_type=jnp.float32)              # (S, d_k)
        # Deferred normalization on the small tile; reciprocal -> EUP slot.
        ctx_h = pv * pl.reciprocal(l, approx=True)
        out_acc = out_acc + jnp.dot(ctx_h.astype(jnp.bfloat16),
                                    wfc[lo:lo + d_k, :],
                                    preferred_element_type=jnp.float32)

    o_ref[0] = (out_acc + bias_ref[3:4, :]).astype(o_ref.dtype)


# ----------------------------------------------------------------------------
# Wrapper: one pallas_call for the whole multi-head attention forward
# ----------------------------------------------------------------------------
def multihead_attention(params, input_Q, input_K, input_V, n_heads):
    B, S, d_model = input_Q.shape
    assert d_model % n_heads == 0
    d_k = d_model // n_heads
    scale = 1.0 / math.sqrt(d_k)

    # One-time weight prep (plain XLA, outside the kernel):
    #  * transpose PyTorch nn.Linear (d_out, d_in) weights to (d_in, d_out)
    #  * fold 1/sqrt(d_k) into W_Q and b_Q
    #  * stack the four weights into one (4, D, D) bf16 block and the four
    #    biases into one (4, D) f32 block -> single DMA stream each.
    w_stack = jnp.stack([params["W_Q_w"].T * scale,
                         params["W_K_w"].T,
                         params["W_V_w"].T,
                         params["fc_w"].T], axis=0).astype(jnp.bfloat16)
    b_stack = jnp.stack([params["W_Q_b"] * scale,
                         params["W_K_b"],
                         params["W_V_b"],
                         params["fc_b"]], axis=0).astype(jnp.float32)

    kernel = functools.partial(_mha_kernel, n_heads=n_heads, d_k=d_k)

    act_spec = pl.BlockSpec((1, S, d_model), lambda b: (b, 0, 0))
    w_spec = pl.BlockSpec((4, d_model, d_model), lambda b: (0, 0, 0))
    bias_spec = pl.BlockSpec((4, d_model), lambda b: (0, 0))

    return pl.pallas_call(
        kernel,
        out_shape=jax.ShapeDtypeStruct((B, S, d_model), input_Q.dtype),
        grid=(B,),
        in_specs=[act_spec, act_spec, act_spec, w_spec, bias_spec],
        out_specs=act_spec,
        compiler_params=pltpu.CompilerParams(
            dimension_semantics=("parallel",),
            vmem_limit_bytes=64 * 1024 * 1024),
    )(input_Q, input_K, input_V, w_stack, b_stack)


# ----------------------------------------------------------------------------
# Pure-JAX f32 reference (PyTorch semantics) for correctness checking
# ----------------------------------------------------------------------------
def reference(params, input_Q, input_K, input_V, n_heads):
    B, S, d_model = input_Q.shape
    d_k = d_model // n_heads

    def lin(x, w, b):
        return x @ w.T + b

    def split_heads(x):
        return x.reshape(B, S, n_heads, d_k).transpose(0, 2, 1, 3)

    Q = split_heads(lin(input_Q, params["W_Q_w"], params["W_Q_b"]))
    K = split_heads(lin(input_K, params["W_K_w"], params["W_K_b"]))
    V = split_heads(lin(input_V, params["W_V_w"], params["W_V_b"]))
    scores = jnp.einsum("bhqd,bhkd->bhqk", Q, K) / math.sqrt(d_k)
    p = jax.nn.softmax(scores, axis=-1)
    prob = jnp.einsum("bhqk,bhkd->bhqd", p, V)
    prob = prob.transpose(0, 2, 1, 3).reshape(B, S, d_model)
    return lin(prob, params["fc_w"], params["fc_b"])


if __name__ == "__main__":
    # Small shapes consistent with the module's forward.
    B, S, d_model, n_heads = 2, 8, 32, 4

    key = jax.random.PRNGKey(0)
    ks = jax.random.split(key, 12)

    def init_w(k):
        return jax.random.normal(k, (d_model, d_model), jnp.float32) * 0.05

    def init_b(k):
        return jax.random.normal(k, (d_model,), jnp.float32) * 0.05

    params = {
        "W_Q_w": init_w(ks[0]), "W_Q_b": init_b(ks[1]),
        "W_K_w": init_w(ks[2]), "W_K_b": init_b(ks[3]),
        "W_V_w": init_w(ks[4]), "W_V_b": init_b(ks[5]),
        "fc_w":  init_w(ks[6]), "fc_b":  init_b(ks[7]),
    }

    input_Q = jax.random.normal(ks[8], (B, S, d_model), jnp.float32)
    input_K = jax.random.normal(ks[9], (B, S, d_model), jnp.float32)
    input_V = jax.random.normal(ks[10], (B, S, d_model), jnp.float32)

    out = multihead_attention(params, input_Q, input_K, input_V, n_heads)
    out = jax.block_until_ready(out)

    ref = reference(params, input_Q, input_K, input_V, n_heads)
    assert out.shape == (B, S, d_model)
    err = float(jnp.max(jnp.abs(out - ref)))
    # Tolerance covers bf16 MXU operands (vs. the f32 reference) plus the
    # approximate EUP reciprocal in the softmax normalization.
    assert err < 2e-2, f"mismatch vs. reference: {err}"

    print("KERNEL_OK")
</pallas_src>

<mosaic_0001>
module attributes {stable_mosaic.version = 11 : i64} {
  func.func @_mha_kernel(%arg0: i32, %arg1: memref<1x8x32xf32, #tpu.memory_space<vmem>>, %arg2: memref<1x8x32xf32, #tpu.memory_space<vmem>>, %arg3: memref<1x8x32xf32, #tpu.memory_space<vmem>>, %arg4: memref<4x32x32xbf16, #tpu.memory_space<vmem>>, %arg5: memref<4x32xf32, #tpu.memory_space<vmem>>, %arg6: memref<1x8x32xf32, #tpu.memory_space<vmem>>) attributes {dimension_semantics = [#tpu.dimension_semantics<parallel>], iteration_bounds = array<i64: 2>, scalar_prefetch = 0 : i64, scratch_operands = 0 : i64, tpu.core_type = #tpu.core_type<tc>, window_params = [{transform_indices = @transform_0, window_bounds = array<i64: 1, 8, 32>}, {transform_indices = @transform_1, window_bounds = array<i64: 1, 8, 32>}, {transform_indices = @transform_2, window_bounds = array<i64: 1, 8, 32>}, {pipeline_mode = #tpu.pipeline_mode<synchronous>, transform_indices = @transform_3, window_bounds = array<i64: 4, 32, 32>}, {pipeline_mode = #tpu.pipeline_mode<synchronous>, transform_indices = @transform_4, window_bounds = array<i64: 4, 32>}, {transform_indices = @transform_5, window_bounds = array<i64: 1, 8, 32>}]} {
    %c0 = arith.constant 0 : index
    %c0_0 = arith.constant 0 : index
    %c0_1 = arith.constant 0 : index
    %0 = vector.load %arg1[%c0, %c0_0, %c0_1] : memref<1x8x32xf32, #tpu.memory_space<vmem>>, vector<1x8x32xf32>
    %1 = vector.shape_cast %0 : vector<1x8x32xf32> to vector<8x32xf32>
    %2 = arith.truncf %1 : vector<8x32xf32> to vector<8x32xbf16>
    %c0_2 = arith.constant 0 : index
    %c0_3 = arith.constant 0 : index
    %c0_4 = arith.constant 0 : index
    %3 = vector.load %arg2[%c0_2, %c0_3, %c0_4] : memref<1x8x32xf32, #tpu.memory_space<vmem>>, vector<1x8x32xf32>
    %4 = vector.shape_cast %3 : vector<1x8x32xf32> to vector<8x32xf32>
    %5 = arith.truncf %4 : vector<8x32xf32> to vector<8x32xbf16>
    %c0_5 = arith.constant 0 : index
    %c0_6 = arith.constant 0 : index
    %c0_7 = arith.constant 0 : index
    %6 = vector.load %arg3[%c0_5, %c0_6, %c0_7] : memref<1x8x32xf32, #tpu.memory_space<vmem>>, vector<1x8x32xf32>
    %7 = vector.shape_cast %6 : vector<1x8x32xf32> to vector<8x32xf32>
    %8 = arith.truncf %7 : vector<8x32xf32> to vector<8x32xbf16>
    %c0_8 = arith.constant 0 : index
    %c0_9 = arith.constant 0 : index
    %c0_10 = arith.constant 0 : index
    %9 = vector.load %arg4[%c0_8, %c0_9, %c0_10] : memref<4x32x32xbf16, #tpu.memory_space<vmem>>, vector<1x32x32xbf16>
    %10 = vector.shape_cast %9 : vector<1x32x32xbf16> to vector<32x32xbf16>
    %c1 = arith.constant 1 : index
    %c0_11 = arith.constant 0 : index
    %c0_12 = arith.constant 0 : index
    %11 = vector.load %arg4[%c1, %c0_11, %c0_12] : memref<4x32x32xbf16, #tpu.memory_space<vmem>>, vector<1x32x32xbf16>
    %12 = vector.shape_cast %11 : vector<1x32x32xbf16> to vector<32x32xbf16>
    %c2 = arith.constant 2 : index
    %c0_13 = arith.constant 0 : index
    %c0_14 = arith.constant 0 : index
    %13 = vector.load %arg4[%c2, %c0_13, %c0_14] : memref<4x32x32xbf16, #tpu.memory_space<vmem>>, vector<1x32x32xbf16>
    %14 = vector.shape_cast %13 : vector<1x32x32xbf16> to vector<32x32xbf16>
    %c3 = arith.constant 3 : index
    %c0_15 = arith.constant 0 : index
    %c0_16 = arith.constant 0 : index
    %15 = vector.load %arg4[%c3, %c0_15, %c0_16] : memref<4x32x32xbf16, #tpu.memory_space<vmem>>, vector<1x32x32xbf16>
    %16 = vector.shape_cast %15 : vector<1x32x32xbf16> to vector<32x32xbf16>
    %cst = arith.constant dense<0.000000e+00> : vector<8x32xf32>
    %17 = tpu.matmul %2, %10, %cst {dimension_numbers = #tpu.dot_dimension_numbers<[1], [0], [0], [1], [0, 0, 1, 1], [], []>} : vector<8x32xbf16>, vector<32x32xbf16>, vector<8x32xf32> -> vector<8x32xf32>
    %c0_17 = arith.constant 0 : index
    %c0_18 = arith.constant 0 : index
    %18 = vector.load %arg5[%c0_17, %c0_18] : memref<4x32xf32, #tpu.memory_space<vmem>>, vector<1x32xf32>
    %19 = vector.broadcast %18 : vector<1x32xf32> to vector<8x32xf32>
    %20 = arith.addf %17, %19 : vector<8x32xf32>
    %cst_19 = arith.constant dense<0.000000e+00> : vector<8x32xf32>
    %21 = tpu.matmul %5, %12, %cst_19 {dimension_numbers = #tpu.dot_dimension_numbers<[1], [0], [0], [1], [0, 0, 1, 1], [], []>} : vector<8x32xbf16>, vector<32x32xbf16>, vector<8x32xf32> -> vector<8x32xf32>
    %c1_20 = arith.constant 1 : index
    %c0_21 = arith.constant 0 : index
    %22 = vector.load %arg5[%c1_20, %c0_21] : memref<4x32xf32, #tpu.memory_space<vmem>>, vector<1x32xf32>
    %23 = vector.broadcast %22 : vector<1x32xf32> to vector<8x32xf32>
    %24 = arith.addf %21, %23 : vector<8x32xf32>
    %cst_22 = arith.constant dense<0.000000e+00> : vector<8x32xf32>
    %25 = tpu.matmul %8, %14, %cst_22 {dimension_numbers = #tpu.dot_dimension_numbers<[1], [0], [0], [1], [0, 0, 1, 1], [], []>} : vector<8x32xbf16>, vector<32x32xbf16>, vector<8x32xf32> -> vector<8x32xf32>
    %c2_23 = arith.constant 2 : index
    %c0_24 = arith.constant 0 : index
    %26 = vector.load %arg5[%c2_23, %c0_24] : memref<4x32xf32, #tpu.memory_space<vmem>>, vector<1x32xf32>
    %27 = vector.broadcast %26 : vector<1x32xf32> to vector<8x32xf32>
    %28 = arith.addf %25, %27 : vector<8x32xf32>
    %29 = arith.truncf %20 : vector<8x32xf32> to vector<8x32xbf16>
    %30 = arith.truncf %24 : vector<8x32xf32> to vector<8x32xbf16>
    %31 = arith.truncf %28 : vector<8x32xf32> to vector<8x32xbf16>
    %cst_25 = arith.constant 0.000000e+00 : f32
    %32 = vector.broadcast %cst_25 : f32 to vector<8x32xf32>
    %33 = vector.extract_strided_slice %29 {offsets = [0, 0], sizes = [8, 8], strides = [1, 1]} : vector<8x32xbf16> to vector<8x8xbf16>
    %34 = vector.extract_strided_slice %30 {offsets = [0, 0], sizes = [8, 8], strides = [1, 1]} : vector<8x32xbf16> to vector<8x8xbf16>
    %35 = vector.extract_strided_slice %31 {offsets = [0, 0], sizes = [8, 8], strides = [1, 1]} : vector<8x32xbf16> to vector<8x8xbf16>
    %cst_26 = arith.constant dense<0.000000e+00> : vector<8x8xf32>
    %36 = tpu.matmul %33, %34, %cst_26 {dimension_numbers = #tpu.dot_dimension_numbers<[1], [1], [0], [0], [0, 0, 1, 0], [], []>} : vector<8x8xbf16>, vector<8x8xbf16>, vector<8x8xf32> -> vector<8x8xf32>
    %cst_27 = arith.constant dense<0xFF800000> : vector<8xf32>
    %37 = vector.multi_reduction <maximumf>, %36, %cst_27 [1] : vector<8x8xf32> to vector<8xf32>
    %38 = vector.shape_cast %37 : vector<8xf32> to vector<8x1xf32>
    %39 = vector.broadcast %38 : vector<8x1xf32> to vector<8x8xf32>
    %40 = arith.subf %36, %39 : vector<8x8xf32>
    %41 = math.exp %40 : vector<8x8xf32>
    %cst_28 = arith.constant dense<0.000000e+00> : vector<8xf32>
    %42 = vector.multi_reduction <add>, %41, %cst_28 [1] : vector<8x8xf32> to vector<8xf32>
    %43 = vector.shape_cast %42 : vector<8xf32> to vector<8x1xf32>
    %44 = arith.truncf %41 : vector<8x8xf32> to vector<8x8xbf16>
    %cst_29 = arith.constant dense<0.000000e+00> : vector<8x8xf32>
    %45 = tpu.matmul %44, %35, %cst_29 {dimension_numbers = #tpu.dot_dimension_numbers<[1], [0], [0], [1], [0, 0, 1, 1], [], []>} : vector<8x8xbf16>, vector<8x8xbf16>, vector<8x8xf32> -> vector<8x8xf32>
    %46 = tpu.reciprocal %43 {approx = true} : vector<8x1xf32> -> vector<8x1xf32>
    %47 = vector.broadcast %46 : vector<8x1xf32> to vector<8x8xf32>
    %48 = arith.mulf %45, %47 : vector<8x8xf32>
    %49 = arith.truncf %48 : vector<8x8xf32> to vector<8x8xbf16>
    %50 = vector.extract_strided_slice %16 {offsets = [0, 0], sizes = [8, 32], strides = [1, 1]} : vector<32x32xbf16> to vector<8x32xbf16>
    %cst_30 = arith.constant dense<0.000000e+00> : vector<8x32xf32>
    %51 = tpu.matmul %49, %50, %cst_30 {dimension_numbers = #tpu.dot_dimension_numbers<[1], [0], [0], [1], [0, 0, 1, 1], [], []>} : vector<8x8xbf16>, vector<8x32xbf16>, vector<8x32xf32> -> vector<8x32xf32>
    %52 = arith.addf %32, %51 : vector<8x32xf32>
    %53 = vector.extract_strided_slice %29 {offsets = [0, 8], sizes = [8, 8], strides = [1, 1]} : vector<8x32xbf16> to vector<8x8xbf16>
    %54 = vector.extract_strided_slice %30 {offsets = [0, 8], sizes = [8, 8], strides = [1, 1]} : vector<8x32xbf16> to vector<8x8xbf16>
    %55 = vector.extract_strided_slice %31 {offsets = [0, 8], sizes = [8, 8], strides = [1, 1]} : vector<8x32xbf16> to vector<8x8xbf16>
    %cst_31 = arith.constant dense<0.000000e+00> : vector<8x8xf32>
    %56 = tpu.matmul %53, %54, %cst_31 {dimension_numbers = #tpu.dot_dimension_numbers<[1], [1], [0], [0], [0, 0, 1, 0], [], []>} : vector<8x8xbf16>, vector<8x8xbf16>, vector<8x8xf32> -> vector<8x8xf32>
    %cst_32 = arith.constant dense<0xFF800000> : vector<8xf32>
    %57 = vector.multi_reduction <maximumf>, %56, %cst_32 [1] : vector<8x8xf32> to vector<8xf32>
    %58 = vector.shape_cast %57 : vector<8xf32> to vector<8x1xf32>
    %59 = vector.broadcast %58 : vector<8x1xf32> to vector<8x8xf32>
    %60 = arith.subf %56, %59 : vector<8x8xf32>
    %61 = math.exp %60 : vector<8x8xf32>
    %cst_33 = arith.constant dense<0.000000e+00> : vector<8xf32>
    %62 = vector.multi_reduction <add>, %61, %cst_33 [1] : vector<8x8xf32> to vector<8xf32>
    %63 = vector.shape_cast %62 : vector<8xf32> to vector<8x1xf32>
    %64 = arith.truncf %61 : vector<8x8xf32> to vector<8x8xbf16>
    %cst_34 = arith.constant dense<0.000000e+00> : vector<8x8xf32>
    %65 = tpu.matmul %64, %55, %cst_34 {dimension_numbers = #tpu.dot_dimension_numbers<[1], [0], [0], [1], [0, 0, 1, 1], [], []>} : vector<8x8xbf16>, vector<8x8xbf16>, vector<8x8xf32> -> vector<8x8xf32>
    %66 = tpu.reciprocal %63 {approx = true} : vector<8x1xf32> -> vector<8x1xf32>
    %67 = vector.broadcast %66 : vector<8x1xf32> to vector<8x8xf32>
    %68 = arith.mulf %65, %67 : vector<8x8xf32>
    %69 = arith.truncf %68 : vector<8x8xf32> to vector<8x8xbf16>
    %70 = vector.extract_strided_slice %16 {offsets = [8, 0], sizes = [8, 32], strides = [1, 1]} : vector<32x32xbf16> to vector<8x32xbf16>
    %cst_35 = arith.constant dense<0.000000e+00> : vector<8x32xf32>
    %71 = tpu.matmul %69, %70, %cst_35 {dimension_numbers = #tpu.dot_dimension_numbers<[1], [0], [0], [1], [0, 0, 1, 1], [], []>} : vector<8x8xbf16>, vector<8x32xbf16>, vector<8x32xf32> -> vector<8x32xf32>
    %72 = arith.addf %52, %71 : vector<8x32xf32>
    %73 = vector.extract_strided_slice %29 {offsets = [0, 16], sizes = [8, 8], strides = [1, 1]} : vector<8x32xbf16> to vector<8x8xbf16>
    %74 = vector.extract_strided_slice %30 {offsets = [0, 16], sizes = [8, 8], strides = [1, 1]} : vector<8x32xbf16> to vector<8x8xbf16>
    %75 = vector.extract_strided_slice %31 {offsets = [0, 16], sizes = [8, 8], strides = [1, 1]} : vector<8x32xbf16> to vector<8x8xbf16>
    %cst_36 = arith.constant dense<0.000000e+00> : vector<8x8xf32>
    %76 = tpu.matmul %73, %74, %cst_36 {dimension_numbers = #tpu.dot_dimension_numbers<[1], [1], [0], [0], [0, 0, 1, 0], [], []>} : vector<8x8xbf16>, vector<8x8xbf16>, vector<8x8xf32> -> vector<8x8xf32>
    %cst_37 = arith.constant dense<0xFF800000> : vector<8xf32>
    %77 = vector.multi_reduction <maximumf>, %76, %cst_37 [1] : vector<8x8xf32> to vector<8xf32>
    %78 = vector.shape_cast %77 : vector<8xf32> to vector<8x1xf32>
    %79 = vector.broadcast %78 : vector<8x1xf32> to vector<8x8xf32>
    %80 = arith.subf %76, %79 : vector<8x8xf32>
    %81 = math.exp %80 : vector<8x8xf32>
    %cst_38 = arith.constant dense<0.000000e+00> : vector<8xf32>
    %82 = vector.multi_reduction <add>, %81, %cst_38 [1] : vector<8x8xf32> to vector<8xf32>
    %83 = vector.shape_cast %82 : vector<8xf32> to vector<8x1xf32>
    %84 = arith.truncf %81 : vector<8x8xf32> to vector<8x8xbf16>
    %cst_39 = arith.constant dense<0.000000e+00> : vector<8x8xf32>
    %85 = tpu.matmul %84, %75, %cst_39 {dimension_numbers = #tpu.dot_dimension_numbers<[1], [0], [0], [1], [0, 0, 1, 1], [], []>} : vector<8x8xbf16>, vector<8x8xbf16>, vector<8x8xf32> -> vector<8x8xf32>
    %86 = tpu.reciprocal %83 {approx = true} : vector<8x1xf32> -> vector<8x1xf32>
    %87 = vector.broadcast %86 : vector<8x1xf32> to vector<8x8xf32>
    %88 = arith.mulf %85, %87 : vector<8x8xf32>
    %89 = arith.truncf %88 : vector<8x8xf32> to vector<8x8xbf16>
    %90 = vector.extract_strided_slice %16 {offsets = [16, 0], sizes = [8, 32], strides = [1, 1]} : vector<32x32xbf16> to vector<8x32xbf16>
    %cst_40 = arith.constant dense<0.000000e+00> : vector<8x32xf32>
    %91 = tpu.matmul %89, %90, %cst_40 {dimension_numbers = #tpu.dot_dimension_numbers<[1], [0], [0], [1], [0, 0, 1, 1], [], []>} : vector<8x8xbf16>, vector<8x32xbf16>, vector<8x32xf32> -> vector<8x32xf32>
    %92 = arith.addf %72, %91 : vector<8x32xf32>
    %93 = vector.extract_strided_slice %29 {offsets = [0, 24], sizes = [8, 8], strides = [1, 1]} : vector<8x32xbf16> to vector<8x8xbf16>
    %94 = vector.extract_strided_slice %30 {offsets = [0, 24], sizes = [8, 8], strides = [1, 1]} : vector<8x32xbf16> to vector<8x8xbf16>
    %95 = vector.extract_strided_slice %31 {offsets = [0, 24], sizes = [8, 8], strides = [1, 1]} : vector<8x32xbf16> to vector<8x8xbf16>
    %cst_41 = arith.constant dense<0.000000e+00> : vector<8x8xf32>
    %96 = tpu.matmul %93, %94, %cst_41 {dimension_numbers = #tpu.dot_dimension_numbers<[1], [1], [0], [0], [0, 0, 1, 0], [], []>} : vector<8x8xbf16>, vector<8x8xbf16>, vector<8x8xf32> -> vector<8x8xf32>
    %cst_42 = arith.constant dense<0xFF800000> : vector<8xf32>
    %97 = vector.multi_reduction <maximumf>, %96, %cst_42 [1] : vector<8x8xf32> to vector<8xf32>
    %98 = vector.shape_cast %97 : vector<8xf32> to vector<8x1xf32>
    %99 = vector.broadcast %98 : vector<8x1xf32> to vector<8x8xf32>
    %100 = arith.subf %96, %99 : vector<8x8xf32>
    %101 = math.exp %100 : vector<8x8xf32>
    %cst_43 = arith.constant dense<0.000000e+00> : vector<8xf32>
    %102 = vector.multi_reduction <add>, %101, %cst_43 [1] : vector<8x8xf32> to vector<8xf32>
    %103 = vector.shape_cast %102 : vector<8xf32> to vector<8x1xf32>
    %104 = arith.truncf %101 : vector<8x8xf32> to vector<8x8xbf16>
    %cst_44 = arith.constant dense<0.000000e+00> : vector<8x8xf32>
    %105 = tpu.matmul %104, %95, %cst_44 {dimension_numbers = #tpu.dot_dimension_numbers<[1], [0], [0], [1], [0, 0, 1, 1], [], []>} : vector<8x8xbf16>, vector<8x8xbf16>, vector<8x8xf32> -> vector<8x8xf32>
    %106 = tpu.reciprocal %103 {approx = true} : vector<8x1xf32> -> vector<8x1xf32>
    %107 = vector.broadcast %106 : vector<8x1xf32> to vector<8x8xf32>
    %108 = arith.mulf %105, %107 : vector<8x8xf32>
    %109 = arith.truncf %108 : vector<8x8xf32> to vector<8x8xbf16>
    %110 = vector.extract_strided_slice %16 {offsets = [24, 0], sizes = [8, 32], strides = [1, 1]} : vector<32x32xbf16> to vector<8x32xbf16>
    %cst_45 = arith.constant dense<0.000000e+00> : vector<8x32xf32>
    %111 = tpu.matmul %109, %110, %cst_45 {dimension_numbers = #tpu.dot_dimension_numbers<[1], [0], [0], [1], [0, 0, 1, 1], [], []>} : vector<8x8xbf16>, vector<8x32xbf16>, vector<8x32xf32> -> vector<8x32xf32>
    %112 = arith.addf %92, %111 : vector<8x32xf32>
    %c3_46 = arith.constant 3 : index
    %c0_47 = arith.constant 0 : index
    %113 = vector.load %arg5[%c3_46, %c0_47] : memref<4x32xf32, #tpu.memory_space<vmem>>, vector<1x32xf32>
    %114 = vector.broadcast %113 : vector<1x32xf32> to vector<8x32xf32>
    %115 = arith.addf %112, %114 : vector<8x32xf32>
    %c0_48 = arith.constant 0 : index
    %c0_49 = arith.constant 0 : index
    %c0_50 = arith.constant 0 : index
    %116 = vector.load %arg6[%c0_48, %c0_49, %c0_50] : memref<1x8x32xf32, #tpu.memory_space<vmem>>, vector<1x8x32xf32>
    %117 = vector.shape_cast %116 : vector<1x8x32xf32> to vector<8x32xf32>
    %118 = vector.shape_cast %115 : vector<8x32xf32> to vector<1x8x32xf32>
    tpu.vector_store %arg6[%c0_48, %c0_49, %c0_50], %118 {strides = array<i32>} : memref<1x8x32xf32, #tpu.memory_space<vmem>>, vector<1x8x32xf32>,
    return
  }
  func.func @transform_0(%arg0: i32) -> (i32, i32, i32) {
    %c0_i32 = arith.constant 0 : i32
    %c0_i32_0 = arith.constant 0 : i32
    %c0_i32_1 = arith.constant 0 : i32
    return %arg0, %c0_i32, %c0_i32_0 : i32, i32, i32
  }
  func.func @transform_1(%arg0: i32) -> (i32, i32, i32) {
    %c0_i32 = arith.constant 0 : i32
    %c0_i32_0 = arith.constant 0 : i32
    %c0_i32_1 = arith.constant 0 : i32
    return %arg0, %c0_i32, %c0_i32_0 : i32, i32, i32
  }
  func.func @transform_2(%arg0: i32) -> (i32, i32, i32) {
    %c0_i32 = arith.constant 0 : i32
    %c0_i32_0 = arith.constant 0 : i32
    %c0_i32_1 = arith.constant 0 : i32
    return %arg0, %c0_i32, %c0_i32_0 : i32, i32, i32
  }
  func.func @transform_3(%arg0: i32) -> (i32, i32, i32) {
    %c0_i32 = arith.constant 0 : i32
    %c0_i32_0 = arith.constant 0 : i32
    %c0_i32_1 = arith.constant 0 : i32
    %c0_i32_2 = arith.constant 0 : i32
    return %c0_i32, %c0_i32_0, %c0_i32_1 : i32, i32, i32
  }
  func.func @transform_4(%arg0: i32) -> (i32, i32) {
    %c0_i32 = arith.constant 0 : i32
    %c0_i32_0 = arith.constant 0 : i32
    %c0_i32_1 = arith.constant 0 : i32
    return %c0_i32, %c0_i32_0 : i32, i32
  }
  func.func @transform_5(%arg0: i32) -> (i32, i32, i32) {
    %c0_i32 = arith.constant 0 : i32
    %c0_i32_0 = arith.constant 0 : i32
    %c0_i32_1 = arith.constant 0 : i32
    return %arg0, %c0_i32, %c0_i32_0 : i32, i32, i32
  }
}

</mosaic_0001>

<bundles_post_ra>
// kernel: tpu_custom_call.1
= control target key start
LH: loop header
LB: loop body
LE: loop exit
PB: predicated region body
PF: predicated region fallthrough
CT: control target
= control target key end

     0   :  { %s1621_s0 = inlined_call_operand.hbm [shape: f32[2,8,32], index: 0, kind: input, shape index: {}]   ;;  %s1622_s1 = inlined_call_operand.hbm [shape: f32[2,8,32], index: 1, kind: input, shape index: {}]   ;;  %s1623_s2 = inlined_call_operand.hbm [shape: f32[2,8,32], index: 2, kind: input, shape index: {}]   ;;  %s1624_s3 = inlined_call_operand.hbm [shape: bf16[4,32,32], index: 3, kind: input, shape index: {}]   ;;  %s1625_s4 = inlined_call_operand.hbm [shape: f32[4,32], index: 4, kind: input, shape index: {}]   ;;  %s1626_s5 = inlined_call_operand.hbm [shape: f32[2,8,32], index: 5, kind: output, shape index: {}]  }
   0x1   :  { %1632 = sst [smem:[#allocation19_spill]] %s1622_s1 }
   0x2   :  { %1633 = sst [smem:[#allocation20_spill]] %s1624_s3 }
   0x3   :  { %10 = vsyncpa [#allocation3], 0 }
   0x4   :  { %12 = vsyncpa [#allocation3 + $0x1], 0 }
   0x5   :  { %13 = vsyncpa [#allocation6], 0 }
   0x6   :  { %15 = vsyncpa [#allocation6 + $0x1], 0 }
   0x7   :  { %16 = vsyncpa [#allocation9], 0 }
   0x8   :  { %17 = vsyncpa [#allocation4], 0 }
   0x9   :  { %19 = vsyncpa [#allocation4 + $0x1], 0  ;;  %s1363_s18 = smov 0   ;;  %s1365_s19 = smov 0  }
   0xa   :  { %s1367_s20 = smov 0   ;;  %s1369_s21 = smov 0  }
   0xb LB: > { %1634 = sst [smem:[#allocation16_spill]] %s1324_s21  ;;  %s1387_s25 = sadd.s32 4294967295, %s1324_s21   ;;  %s1324_s21 = sphi %s1369_s21, %s1650_s21   ;;  %s1320_s20 = sphi %s1367_s20, %s1654_s20   ;;  %s1316_s19 = sphi %s1365_s19, %s1653_s19   ;;  %s1312_s18 = sphi %s1363_s18, %s1652_s18  }
   0xc   : > { %s1635_s3 = sld [smem:[#allocation20_spill]]  ;;  %p932_p0 = scmp.ge.s32.totalorder %s1324_s21, 1 }
   0xd   : > { %p1631_p1 = scmp.eq.s32.totalorder %s1387_s25, 0  ;;  %p176_p2 = scmp.lt.s32.totalorder %s1324_s21, 3 }
   0xe   : > { %s1326_s27 = smov [#allocation8]   ;;  %s1327_s30 = smov 64  }
   0xf   : > { %p1392_p3 = pnand %p932_p0, %p176_p2  ;;  %s189_s28 = sshll.u32 %s1326_s27, 4  ;;  %s190_s28 = int_to_ptr.vmem [resolvable:$true] %s189_s28 }
  0x10   : > { %s1328_s6 = smov 4   ;;  %s931_s7 = sadd.s32 4294967294, %s1324_s21  }
  0x11   : > { %p1014_p4 = pneg %p1392_p3  ;;  %s1409_s8 = sadd.s32 1, %s1324_s21  }
  0x12   : > { %s187_s24 = sshll.u32 %s1635_s3, 4  ;;  %1638 = sst [smem:[#allocation17_spill]] %s1409_s8  ;;  %s188_s24 = int_to_ptr.hbm [resolvable:$true] %s187_s24 }
  0x13   : > { %p1401_p6 = pnand %p1014_p4, %p1631_p1  ;;  %s32_s9 = sadd.s32 1, %s1320_s20 }
  0x14   : > { %s29_s10 = ssub.s32 %s1324_s21, %s1409_s8  ;;  %p39_p7 = scmp.ne.s32.totalorder %s1320_s20, %s1316_s19 }
  0x15   : > { %1017 = dma.hbm_to_vmem [thread:$0]  (!%p1401_p6), %s188_s24, 1024, %s190_s28, [#allocation9], %s1327_s30, %s1327_s30, %s1328_s6  }
  0x16   : > { %p30_p8 = scmp.eq.s32.totalorder %s29_s10, 0  ;;  %p40_p9 = scmp.eq.s32.totalorder %s1324_s21, 0 }
  0x17   : > { %p45_p10 = scmp.ne.s32.totalorder %s1316_s19, %s1312_s18  ;;  %p163_p11 = scmp.eq.s32.totalorder %s1387_s25, 1 }
  0x18   : > { %s1421_s11 = scalar_select %p30_p8, %s1320_s20, %s32_s9  }
  0x19   : > { %p41_p12 = por %p40_p9, %p39_p7  ;;  %p1425_p13 = por %p1631_p1, %p45_p10 }
  0x1a   : > { %1639 = sst [smem:[#allocation18_spill]] %s1421_s11  ;;  %p1429_p0 = por %p163_p11, %p39_p7 }
  0x1b   : > { %p169_p2 = scmp.eq.s32.totalorder %s931_s7, 1  ;;  %p1037_p4 = scmp.lt.s32.totalorder %s1324_s21, 2 }
  0x1c   : > { %s1627_s14 = sand.u32 1, %s1320_s20   ;;  %s1444_s17 = sshll.u32 %s1324_s21, 3 }
  0x1d   : > { %p1435_p5 = por %p169_p2, %p45_p10  ;;  %s1441_s16 = sshll.u32 %s1627_s14, 3 }
  0x1e   : > { %p1446_p8 = pnand %p1037_p4, %p41_p12  ;;  %s234_s23 = sand.u32 1, %s1324_s21  }
  0x1f   : > { %s1644_s1 = sld [smem:[#allocation19_spill]]  ;;  %s238_s30 = scalar_lea.vmem [#allocation5], %s1441_s16 }
  0x20   : > { %s246_s6 = sshll.u32 %s238_s30, 4  ;;  %s202_s14 = sshll.u32 %s1625_s4, 4  ;;  %s247_s6 = int_to_ptr.vmem [resolvable:$true] %s246_s6  ;;  %s203_s14 = int_to_ptr.hbm [resolvable:$true] %s202_s14 }
  0x21   : > { %s1459_s3 = scalar_lea.sflag [#allocation6], %s234_s23  ;;  %p1134_p9 = pneg %p1446_p8 }
  0x25   : > { %s242_s28 = scalar_lea.hbm %s1644_s1, %s1444_s17 }
  0x26   : > { %s244_s7 = sshll.u32 %s242_s28, 4  ;;  %s1137_s28 = scalar_lea.hbm %s1644_s1, 16  ;;  %s245_s7 = int_to_ptr.hbm [resolvable:$true] %s244_s7 }
  0x27   : > { %s1130_s11 = sshra.s32 %s245_s7, 4  ;;  %s1131_s11 = int_to_ptr.hbm [resolvable:$true] %s1130_s11 }
  0x28   : > { %s1132_s8 = scalar_lea.hbm %s1131_s11, 8  ;;  %p1138_p12 = scmp.lt.s32.totalorder %s1131_s11, %s1644_s1 }
  0x29   : > { %p1133_p7 = scmp.ne.s32.totalorder %s1131_s11, %s1132_s8  ;;  %p1139_p2 = scmp.lt.s32.totalorder %s1137_s28, %s1132_s8 }
  0x2b   : > { %p1135_p10 = pnand %p1134_p9, %p1133_p7  ;;  %p1140_p4 = por %p1139_p2, %p1138_p12 }
  0x2d   : > { %p1136_p11 = pneg %p1135_p10 }
  0x2f   : > { %p1141_p1 = pnand %p1140_p4, %p1136_p11 }
  0x31   : > { %1144 = shalt.err (!%p1141_p1)
}
  0x32   : > { %1027 = dma.hbm_to_vmem [thread:$0]  (!%p1446_p8), %s245_s7, 128, %s247_s6, %s1459_s3  }
  0x33   : > { %s1329_s23 = smov [#allocation10]   ;;  %s223_s11 = scalar_lea.hbm %s1621_s0, %s1444_s17 }
  0x34   : > { %s204_s9 = sshll.u32 %s1329_s23, 4  ;;  %s219_s10 = scalar_lea.vmem [#allocation2], %s1441_s16  ;;  %s205_s9 = int_to_ptr.vmem [resolvable:$true] %s204_s9 }
  0x35   : > { %1020 = dma.hbm_to_vmem [thread:$0]  (!%p1401_p6), %s203_s14, 64, %s205_s9, [#allocation9]  }
  0x36   : > { %s227_s24 = sshll.u32 %s219_s10, 4  ;;  %s225_s27 = sshll.u32 %s223_s11, 4  ;;  %s228_s24 = int_to_ptr.vmem [resolvable:$true] %s227_s24  ;;  %s226_s27 = int_to_ptr.hbm [resolvable:$true] %s225_s27 }
  0x37   : > { %s1645_s28 = sand.u32 1, %s1320_s20   ;;  %s1190_s1 = sshra.s32 %s226_s27, 4  ;;  %s1191_s1 = int_to_ptr.hbm [resolvable:$true] %s1190_s1 }
  0x38   : > { %s216_s30 = scalar_lea.sflag [#allocation3], %s1645_s28  ;;  %s1192_s6 = scalar_lea.hbm %s1191_s1, 8 }
  0x39   : > { %p1193_p1 = scmp.ne.s32.totalorder %s1191_s1, %s1192_s6  ;;  %s1197_s7 = scalar_lea.hbm %s1621_s0, 16 }
  0x3a   : > { %p1198_p6 = scmp.lt.s32.totalorder %s1191_s1, %s1621_s0  ;;  %p1199_p11 = scmp.lt.s32.totalorder %s1197_s7, %s1192_s6 }
  0x3b   : > { %p1195_p7 = pnand %p1193_p1, %p1134_p9 }
  0x3c   : > { %p1200_p12 = por %p1199_p11, %p1198_p6 }
  0x3d   : > { %p1196_p10 = pneg %p1195_p7 }
  0x3f   : > { %p1201_p2 = pnand %p1200_p12, %p1196_p10 }
  0x41   : > { %1204 = shalt.err (!%p1201_p2)
}
  0x42   : > { %1024 = dma.hbm_to_vmem [thread:$0]  (!%p1446_p8), %s226_s27, 128, %s228_s24, %s216_s30  }
  0x43   : > { %s261_s11 = scalar_lea.hbm %s1623_s2, %s1444_s17  ;;  %s257_s10 = scalar_lea.vmem [#allocation7], %s1441_s16 }
  0x44   : > { %s265_s28 = sshll.u32 %s257_s10, 4  ;;  %s263_s29 = sshll.u32 %s261_s11, 4  ;;  %s266_s28 = int_to_ptr.vmem [resolvable:$true] %s265_s28  ;;  %s264_s29 = int_to_ptr.hbm [resolvable:$true] %s263_s29 }
  0x45   : > { %s1220_s1 = sshra.s32 %s264_s29, 4  ;;  %s1227_s24 = scalar_lea.hbm %s1623_s2, 16  ;;  %s1221_s1 = int_to_ptr.hbm [resolvable:$true] %s1220_s1 }
  0x46   : > { %s1222_s6 = scalar_lea.hbm %s1221_s1, 8  ;;  %p1228_p10 = scmp.lt.s32.totalorder %s1221_s1, %s1623_s2 }
  0x47   : > { %p1223_p4 = scmp.ne.s32.totalorder %s1221_s1, %s1222_s6  ;;  %p1229_p6 = scmp.lt.s32.totalorder %s1227_s24, %s1222_s6 }
  0x49   : > { %p1225_p1 = pnand %p1223_p4, %p1134_p9  ;;  %p1230_p11 = por %p1229_p6, %p1228_p10 }
  0x4b   : > { %p1226_p7 = pneg %p1225_p1 }
  0x4d   : > { %p1231_p12 = pnand %p1230_p11, %p1226_p7 }
  0x4f   : > { %1234 = shalt.err (!%p1231_p12)
}
  0x50   : > { %1030 = dma.hbm_to_vmem [thread:$0]  (!%p1446_p8), %s264_s29, 128, %s266_s28, %s1459_s3  }
  0x51   : > { %274 = sbr.rel (%p1392_p3) target bundleno = 1197 (0x4ad), region = 40  ;;  %s1515_s16 = sand.u32 (!%p1392_p3), 1, %s1316_s19  }
  0x52   : > { %s1518_s17 = sshll.u32 (!%p1392_p3), %s1515_s16, 3  ;;  %s277_s23 = scalar_lea.sflag (!%p1392_p3), [#allocation3], %s1515_s16 }
  0x53   : > { %s280_s9 = scalar_lea.vmem (!%p1392_p3), [#allocation2], %s1518_s17 }
  0x56   : > { %1295 = dma.done.wait (%p1425_p13), %s277_s23, 128  }
  0x57   : > { %1297 = vsyncadd (%p1425_p13), %s277_s23, 4294967168  ;;  %s286_s3 = sand.u32 1, %s1387_s25   ;;  %s290_s22 = scalar_lea.vmem [#allocation5], %s1518_s17 }
  0x58   : > { %s287_s26 = scalar_lea.sflag [#allocation6], %s286_s3 }
  0x59   : > { %1299 = dma.done.wait (%p1425_p13), %s287_s26, 256  }
  0x5a   : > { %1301 = vsyncadd (%p1425_p13), %s287_s26, 4294967040  ;;  %s300_s21 = scalar_lea.vmem [#allocation7], %s1518_s17  ;;  %p1646_p3 = scmp.eq.s32.totalorder %s1387_s25, 0 }
  0x5c   : > { %1303 = dma.done.wait (%p1646_p3), [#allocation9], 1088   ;;  %p1647_p8 = pmov %p1646_p3 }
  0x5d   : > { %v993_v0 = vld [vmem:[#allocation8 + $0x8] sm:$0xff]  ;;  %v995_v1 = vld [vmem:[#allocation8 + $0x18] sm:$0xff]  ;;  %v992_v2 = vld [vmem:[#allocation8] sm:$0xff]  ;;  %vm388_vm0 = vcmask 261120   ;;  %vm468_vm1 = vcmask 64512   ;;  %s1330_s12 = smov 112  }
  0x5e   : > { %1305 = vsyncadd (%p1647_p8), [#allocation9], 4294966208  ;;  %v994_v3 = vld [vmem:[#allocation8 + $0x10] sm:$0xff]  ;;  %398 = vmatpush.bf16.msra.mxu0 %v993_v0  ;;  %428 = vmatpush.bf16.msra.mxu1 %v995_v1  ;;  %v351_v5 = vld [vmem:[%s290_s22] sm:$0xff]  ;;  %s1331_s8 = smov 104   ;;  %s1332_s11 = smov 120  }
  0x5f   : > { %v349_v4 = vld [vmem:[%s280_s9] sm:$0xff]  ;;  %v352_v7 = vpack.c.bf16 %v351_v5, %v351_v5  ;;  %v1081_v8 = vld [vmem:[#allocation10 + $0x1] ss:$0 sm:$0xff]  ;;  %v1080_v11 = vld [vmem:[#allocation10] ss:$0 sm:$0xff]  ;;  %vm501_vm2 = vcmask 1043456  }
  0x60   : > { %v350_v6 = vpack.c.bf16 %v349_v4, %v349_v4  ;;  %v997_v23 = vld [vmem:[#allocation8 + $0x28] sm:$0xff]  ;;  %v996_v24 = vld [vmem:[#allocation8 + $0x20] sm:$0xff]  ;;  %v353_v25 = vld [vmem:[%s300_s21] sm:$0xff]  ;;  %s989_s10 = sshll.u32 %s1387_s25, 3  ;;  %s347_s6 = scalar_lea.vmem [#allocation11], %s1518_s17 }
  0x61   : > { %458 = vmatpush.bf16.msra.mxu2 %v997_v23  ;;  %v354_v26 = vpack.c.bf16 %v353_v25, %v353_v25  ;;  %v1082_v30 = vld [vmem:[#allocation10 + $0x2] ss:$0 sm:$0xff]  ;;  %v370_v33 = vld [vmem:[#allocation8 + $0x30] sm:$0xf]  ;;  %s794_s1 = scalar_lea.hbm %s1626_s5, %s989_s10  ;;  %s796_s14 = sshll.u32 %s347_s6, 4  ;;  %s797_s14 = int_to_ptr.vmem [resolvable:$true] %s796_s14 }
  0x62   : > { %399 = vmatpush.bf16.msra.mxu0 %v992_v2  ;;  %429 = vmatpush.bf16.msra.mxu1 %v994_v3  ;;  %v610_v35 = vsel %vm501_vm2, %v370_v33, 0  ;;  %s798_s7 = sshll.u32 %s794_s1, 4  ;;  %s784_s25 = scalar_lea.sflag [#allocation4], %s1515_s16  ;;  %s799_s7 = int_to_ptr.hbm [resolvable:$true] %s798_s7 }
  0x63   : > { %s1264_s24 = sshra.s32 %s799_s7, 4  ;;  %s1270_s17 = scalar_lea.hbm %s1626_s5, 16  ;;  %s1265_s24 = int_to_ptr.hbm [resolvable:$true] %s1264_s24 }
  0x64   : > { %s1266_s27 = scalar_lea.hbm %s1265_s24, 8  ;;  %p1271_p4 = scmp.lt.s32.totalorder %s1265_s24, %s1626_s5 }
  0x65   : > { %957 = vmatmul.msk.bf16.vlgmr.msra.gmra.mxu0 %vm388_vm0, %v350_v6  ;;  %966 = vmatmul.msk.bf16.vlgmr.msra.gmra.mxu1 %vm388_vm0, %v352_v7  ;;  %p1267_p13 = scmp.ne.s32.totalorder %s1265_s24, %s1266_s27  ;;  %p1272_p1 = scmp.lt.s32.totalorder %s1270_s17, %s1266_s27 }
  0x66   : > { %459 = vmatpush.bf16.msra.mxu2 %v996_v24 }
  0x67   : > { %p1268_p9 = pnand %p1267_p13, %p1429_p0  ;;  %p1273_p7 = por %p1272_p1, %p1271_p4 }
  0x69   : > { %975 = vmatmul.msk.bf16.vlgmr.msra.gmra.mxu2 %vm388_vm0, %v354_v26  ;;  %p1269_p2 = pneg %p1268_p9 }
  0x6b   : > { %p1274_p10 = pnand %p1273_p7, %p1269_p2 }
  0xe2   : > { %v401_v9 = vpop.f32.mrf.mxu0  ;;  %v431_v10 = vpop.f32.mrf.mxu1 }
  0xe3   : > { %v432_v12 = vadd.f32 %v1081_v8, %v431_v10  ;;  %v402_v14 = vadd.f32 %v1080_v11, %v401_v9 }
  0xe5   : > { %v466_v13 = vpack.c.bf16 %v432_v12, %v432_v12  ;;  %v465_v20 = vpack.c.bf16 %v402_v14, %v402_v14 }
  0xe7   : > { %v527_v15 = vunpack.c.l.b16 %v466_v13  ;;  %v473_v16 = vsel %vm468_vm1, %v466_v13, 0  ;;  %v522_v21 = vunpack.c.l.b16 %v465_v20 }
  0xe8   : > { %482 = vmatpush.bf16.xpose.msra.mxu3 %v473_v16 }
  0xe9   : > { %v528_v17 = vpack.c.b16 %v527_v15, %v527_v15  ;;  %v523_v22 = vpack.c.b16 %v522_v21, %v522_v21 }
  0xea   : > { %v403_v18 = vpop.f32.mrf.mxu0  ;;  %v433_v19 = vpop.f32.mrf.mxu1 }
  0xeb   : > { %627 = vrot.lane.b32.xlu2 %v528_v17, %s1330_s12 }
  0xec   : > { %v461_v31 = vpop.f32.mrf.mxu2 }
  0xed   : > { %v462_v32 = vadd.f32 %v1082_v30, %v461_v31 }
  0xef   : > { %976 = vmatmul.msk.bf16.vlgmr.msra.gmra.mxu3 %vm468_vm1, %v465_v20  ;;  %v467_v34 = vpack.c.bf16 %v462_v32, %v462_v32  ;;  %v371_v32 = vld [vmem:[#allocation8 + $0x34] sm:$0xf] }
  0xf0   : > { %v591_v33 = vsel %vm501_vm2, %v371_v32, 0 }
  0xf1   : > { %v561_v36 = vunpack.c.l.b16 %v467_v34  ;;  %v503_v37 = vsel %vm501_vm2, %v467_v34, 0  ;;  %600 = vmatpush.bf16.msrb.mxu3 %v591_v33  ;;  %v372_v34 = vld [vmem:[#allocation8 + $0x38] sm:$0xf] }
  0xf2   : > { %512 = vmatpush.bf16.msrb.mxu0 %v503_v37  ;;  %v373_v37 = vld [vmem:[#allocation8 + $0x3c] sm:$0xf] }
  0xf3   : > { %704 = vrot.lane.b32.xlu2 %v528_v17, %s1331_s8  ;;  %v562_v38 = vpack.c.b16 %v561_v36, %v561_v36 }
  0xf4   : > { %v463_v39 = vpop.f32.mrf.mxu2 }
  0xf6   : > { %619 = vmatpush.bf16.msra.mxu0 %v610_v35  ;;  %v686_v35 = vsel %vm501_vm2, %v372_v34, 0 }
  0xf7   : > { %695 = vmatpush.bf16.msra.mxu3 %v686_v35 }
  0xfb   : > { %625 = vrot.lane.b32.xlu2 %v523_v22, %s1330_s12 }
 0x103   : > { %702 = vrot.lane.b32.xlu2 %v523_v22, %s1331_s8 }
 0x10b   : > { %563 = vrot.lane.b32.xlu2 %v562_v38, %s1332_s11 }
 0x145   : > { %v628_v41 = vpop.permute.xlu2 %627 }
 0x146   : > { %v633_v51 = vsel %vm468_vm1, %v628_v41, 0 }
 0x14d   : > { %v705_v45 = vpop.permute.xlu2 %704 }
 0x14e   : > { %v710_v48 = vsel %vm468_vm1, %v705_v45, 0 }
 0x155   : > { %v626_v52 = vpop.permute.xlu2 %625 }
 0x15d   : > { %v703_v53 = vpop.permute.xlu2 %702 }
 0x165   : > { %v564_v54 = vpop.permute.xlu2 %563 }
 0x166   : > { %v569_v55 = vsel %vm501_vm2, %v564_v54, 0 }
 0x167   : > { %578 = vmatpush.bf16.msrb.mxu2 %v569_v55 }
 0x172   : > { %v484_v27 = vpop.f32.mrf.mxu3 }
 0x173   : > { %v488_v28 = vsel %vm468_vm1, %v484_v27, -inf }
 0x174   : > { %489 = vmax.xlane.f32.xlu0 %v488_v28 }
 0x17a   : > { %v486_v29 = vpop.f32.mrf.mxu3 }
 0x188   : > { %529 = vrot.lane.b32.xlu0 %v528_v17, %s1332_s11 }
 0x1e7   : > { %v490_v40 = vpop.xlane.xlu0 %489 }
 0x1e8   : > { %v491_v42 = vsub.f32 %v484_v27, %v490_v40 }
 0x1ea   : > { %v492_v43 = vmul.f32 1.442695, %v491_v42 }
 0x1ec   : > { %1084 = vpow2.f32 %v492_v43 }
 0x1f2   : > { %v1085_v44 = vpop.eup %1084 }
 0x1f3   : > { %v494_v46 = vsel %vm468_vm1, %v1085_v44, 0.0  ;;  %v497_v47 = vpack.c.bf16 %v1085_v44, %v1085_v44 }
 0x1f4   : > { %495 = vadd.xlane.f32.xlu1 %v494_v46 }
 0x1f5   : > { %977 = vmatmul.msk.bf16.vlgmr.msrb.gmra.mxu0 %vm468_vm1, %v497_v47 }
 0x1f6   : > { %719 = vmatpush.bf16.xpose.msrb.mxu0 %v710_v48 }
 0x1fa   : > { %v530_v49 = vpop.permute.xlu0 %529 }
 0x1fb   : > { %v535_v50 = vsel %vm468_vm1, %v530_v49, 0 }
 0x1fc   : > { %544 = vmatpush.bf16.xpose.msrb.mxu1 %v535_v50 }
 0x204   : > { %642 = vmatpush.bf16.xpose.msra.mxu1 %v633_v51 }
 0x20d   : > { %524 = vrot.lane.b32.xlu1 %v523_v22, %s1332_s11 }
 0x267   : > { %v496_v56 = vpop.xlane.xlu1 %495 }
 0x268   : > { %1086 = vrcp.f32 %v496_v56 }
 0x26e   : > { %v1087_v57 = vpop.eup %1086 }
 0x272   : > { %v514_v58 = vpop.f32.mrf.mxu0 }
 0x273   : > { %v519_v59 = vmul.f32 %v1087_v57, %v514_v58 }
 0x275   : > { %v520_v60 = vpack.c.bf16 %v519_v59, %v519_v59 }
 0x277   : > { %981 = vmatmul.msk.bf16.vlgmr.msra.gmra.mxu0 %vm468_vm1, %v520_v60 }
 0x27a   : > { %v516_v61 = vpop.f32.mrf.mxu0 }
 0x27f   : > { %v525_v62 = vpop.permute.xlu1 %524 }
 0x280   : > { %978 = vmatmul.msk.bf16.vlgmr.msrb.gmra.mxu1 %vm468_vm1, %v525_v62  ;;  %v1083_v62 = vld [vmem:[#allocation10 + $0x3] ss:$0 sm:$0xff] }
 0x287   : > { %985 = vmatmul.msk.bf16.vlgmr.msrb.gmra.mxu0 %vm468_vm1, %v703_v53 }
 0x290   : > { %982 = vmatmul.msk.bf16.vlgmr.msra.gmra.mxu1 %vm468_vm1, %v626_v52 }
 0x2f4   : > { %v1564_v63 = vpop.f32.mrf.mxu0 }
 0x2fc   : > { %v623_v0 = vpop.f32.mrf.mxu0 }
 0x2fd   : > { %v546_v1 = vpop.f32.mrf.mxu1 }
 0x2fe   : > { %v550_v2 = vsel %vm468_vm1, %v546_v1, -inf }
 0x2ff   : > { %551 = vmax.xlane.f32.xlu0 %v550_v2 }
 0x304   : > { %v721_v3 = vpop.f32.mrf.mxu0 }
 0x305   : > { %v548_v4 = vpop.f32.mrf.mxu1  ;;  %v725_v5 = vsel %vm468_vm1, %v721_v3, -inf }
 0x306   : > { %726 = vmax.xlane.f32.xlu2 %v725_v5 }
 0x30c   : > { %v723_v6 = vpop.f32.mrf.mxu0 }
 0x30d   : > { %v644_v7 = vpop.f32.mrf.mxu1 }
 0x30e   : > { %v648_v8 = vsel %vm468_vm1, %v644_v7, -inf }
 0x30f   : > { %649 = vmax.xlane.f32.xlu1 %v648_v8 }
 0x313   : > { %658 = vrot.lane.b32.xlu0 %v562_v38, %s1330_s12 }
 0x315   : > { %v646_v9 = vpop.f32.mrf.mxu1 }
 0x328   : > { %735 = vrot.lane.b32.xlu1 %v562_v38, %s1331_s8  ;;  %v763_v38 = vsel %vm501_vm2, %v373_v37, 0 }
 0x372   : > { %v552_v10 = vpop.xlane.xlu0 %551 }
 0x373   : > { %v553_v11 = vsub.f32 %v546_v1, %v552_v10 }
 0x375   : > { %v554_v12 = vmul.f32 1.442695, %v553_v11 }
 0x377   : > { %1088 = vpow2.f32 %v554_v12 }
 0x379   : > { %v727_v13 = vpop.xlane.xlu2 %726 }
 0x37a   : > { %v728_v14 = vsub.f32 %v721_v3, %v727_v13 }
 0x37c   : > { %v729_v15 = vmul.f32 1.442695, %v728_v14 }
 0x37d   : > { %v1089_v16 = vpop.eup %1088 }
 0x37e   : > { %1090 = vpow2.f32 %v729_v15  ;;  %v556_v17 = vsel %vm468_vm1, %v1089_v16, 0.0  ;;  %v559_v18 = vpack.c.bf16 %v1089_v16, %v1089_v16 }
 0x37f   : > { %557 = vadd.xlane.f32.xlu2 %v556_v17 }
 0x380   : > { %979 = vmatmul.msk.bf16.vlgmr.msrb.gmra.mxu2 %vm468_vm1, %v559_v18 }
 0x382   : > { %v650_v19 = vpop.xlane.xlu1 %649 }
 0x383   : > { %v651_v20 = vsub.f32 %v644_v7, %v650_v19 }
 0x384   : > { %v1091_v21 = vpop.eup %1090 }
 0x385   : > { %v652_v22 = vmul.f32 1.442695, %v651_v20  ;;  %v659_v23 = vpop.permute.xlu0 %658  ;;  %v731_v24 = vsel %vm468_vm1, %v1091_v21, 0.0  ;;  %v734_v31 = vpack.c.bf16 %v1091_v21, %v1091_v21 }
 0x386   : > { %v664_v25 = vsel %vm501_vm2, %v659_v23, 0  ;;  %732 = vadd.xlane.f32.xlu0 %v731_v24 }
 0x387   : > { %1092 = vpow2.f32 %v652_v22  ;;  %673 = vmatpush.bf16.msra.mxu2 %v664_v25 }
 0x38b   : > { %772 = vmatpush.bf16.msrb.mxu2 %v763_v38 }
 0x38d   : > { %v1093_v26 = vpop.eup %1092 }
 0x38e   : > { %v657_v27 = vpack.c.bf16 %v1093_v26, %v1093_v26  ;;  %v654_v28 = vsel %vm468_vm1, %v1093_v26, 0.0 }
 0x38f   : > { %655 = vadd.xlane.f32.xlu2 %v654_v28 }
 0x390   : > { %983 = vmatmul.msk.bf16.vlgmr.msra.gmra.mxu2 %vm468_vm1, %v657_v27 }
 0x39a   : > { %v736_v29 = vpop.permute.xlu1 %735 }
 0x39b   : > { %v741_v30 = vsel %vm501_vm2, %v736_v29, 0 }
 0x39c   : > { %750 = vmatpush.bf16.msrb.mxu1 %v741_v30 }
 0x39f   : > { %986 = vmatmul.msk.bf16.vlgmr.msrb.gmra.mxu1 %vm468_vm1, %v734_v31 }
 0x3f2   : > { %v558_v36 = vpop.xlane.xlu2 %557 }
 0x3f3   : > { %1094 = vrcp.f32 %v558_v36 }
 0x3f9   : > { %v1095_v39 = vpop.eup %1094  ;;  %v733_v46 = vpop.xlane.xlu0 %732 }
 0x402   : > { %v656_v43 = vpop.xlane.xlu2 %655 }
 0x403   : > { %v580_v40 = vpop.f32.mrf.mxu2  ;;  %1096 = vrcp.f32 %v656_v43 }
 0x404   : > { %v585_v41 = vmul.f32 %v1095_v39, %v580_v40  ;;  %1098 = vrcp.f32 %v733_v46 }
 0x406   : > { %v586_v42 = vpack.c.bf16 %v585_v41, %v585_v41 }
 0x408   : > { %980 = vmatmul.msk.bf16.vlgmr.msrb.gmra.mxu3 %vm468_vm1, %v586_v42 }
 0x409   : > { %v1097_v45 = vpop.eup %1096 }
 0x40a   : > { %v1099_v51 = vpop.eup %1098 }
 0x40b   : > { %v582_v44 = vpop.f32.mrf.mxu2 }
 0x413   : > { %v675_v47 = vpop.f32.mrf.mxu2 }
 0x414   : > { %v680_v48 = vmul.f32 %v1097_v45, %v675_v47 }
 0x416   : > { %v681_v49 = vpack.c.bf16 %v680_v48, %v680_v48 }
 0x418   : > { %984 = vmatmul.msk.bf16.vlgmr.msra.gmra.mxu3 %vm468_vm1, %v681_v49 }
 0x41b   : > { %v677_v50 = vpop.f32.mrf.mxu2 }
 0x41c   : > { %v752_v52 = vpop.f32.mrf.mxu1 }
 0x41d   : > { %v757_v53 = vmul.f32 %v1099_v51, %v752_v52 }
 0x41f   : > { %v758_v54 = vpack.c.bf16 %v757_v53, %v757_v53 }
 0x421   : > { %987 = vmatmul.msk.bf16.vlgmr.msrb.gmra.mxu2 %vm468_vm1, %v758_v54 }
 0x424   : > { %v754_v55 = vpop.f32.mrf.mxu1 }
 0x48b   : > { %v602_v56 = vpop.f32.mrf.mxu3 }
 0x48c   : > { %v622_v59 = vadd.f32 %v1564_v63, %v602_v56 }
 0x493   : > { %v604_v57 = vpop.f32.mrf.mxu3 }
 0x49b   : > { %v697_v58 = vpop.f32.mrf.mxu3 }
 0x49c   : > { %v701_v60 = vadd.f32 %v697_v58, %v622_v59 }
 0x4a3   : > { %v699_v61 = vpop.f32.mrf.mxu3 }
 0x4a4   : > { %v774_v0 = vpop.f32.mrf.mxu2 }
 0x4a5   : > { %v778_v1 = vadd.f32 %v774_v0, %v701_v60 }
 0x4a7   : > { %v781_v2 = vadd.f32 %v1083_v62, %v778_v1 }
 0x4a9   : > { %782 = vst.msk [vmem:[%s347_s6] sm:$0xff] %vm388_vm0, %v781_v2 }
 0x4aa   : > { %1277 = shalt.err (!%p1274_p10)
}
 0x4ab   : > { %1012 = dma.vmem_to_hbm [thread:$0]  (%p1429_p0), %s797_s14, 128, %s799_s7, %s784_s25  }
 0x4ac   : > { %v776_v63 = vpop.f32.mrf.mxu2 }
 0x4ad PF: > { %s1648_s16 = sld [smem:[#allocation16_spill]]  ;;  %s810_s26 = sand.u32 1, %s1312_s18  }
 0x4ae   : > { %s811_s22 = scalar_lea.sflag [#allocation4], %s810_s26 }
 0x4b3   : > { %p1649_p6 = scmp.ge.s32.totalorder %s1648_s16, 2 }
 0x4b5   : > { %p1032_p11 = pnand %p1649_p6, %p1435_p5 }
 0x4b7   : > { %p1033_p12 = pneg %p1032_p11 }
 0x4b9   : > { %1307 = dma.done.wait (%p1033_p12), %s811_s22, 128  }
 0x4ba   : > { %1309 = vsyncadd (%p1033_p12), %s811_s22, 4294967168  ;;  %s1650_s21 = sld [smem:[#allocation17_spill]]  ;;  %s1652_s18 = smov %s1316_s19 }
 0x4bb   : > { %s1651_s12 = sld [smem:[#allocation18_spill]]  ;;  %s1653_s19 = smov %s1320_s20 }
 0x4c0   : > { %p22_p3 = scmp.ge.s32.totalorder %s1650_s21, 4  }
 0x4c1   : > { %s1654_s20 = smov %s1651_s12 }
 0x4c2   :  { %24 = sbr.rel (!%p22_p3) target bundleno = 11 (0xb), region = 120 }
 0x4c7   :  { %817 = vsyncpa [#allocation3], 1 }
 0x4c8   :  { %819 = vsyncpa [#allocation3 + $0x1], 1 }
 0x4c9   :  { %820 = vsyncpa [#allocation6], 1 }
 0x4ca   :  { %822 = vsyncpa [#allocation6 + $0x1], 1 }
 0x4cb   :  { %823 = vsyncpa [#allocation9], 1 }
 0x4cc   :  { %824 = vsyncpa [#allocation4], 1 }
 0x4cd   :  { %826 = vsyncpa [#allocation4 + $0x1], 1 }

</bundles_post_ra>
